<compile_context>
chip_gen: v5e
topology: v5e:2x2
jax: 0.10.0
libtpu: 0.0.40
codegen_flags: <defaults>
</compile_context>

<pallas_src>
import functools

import jax
import jax.numpy as jnp
from jax.experimental import pallas as pl
from jax.experimental.pallas import tpu as pltpu


def _round_up(a, m):
    return (a + m - 1) // m * m


def _is_256_mxu_tpu():
    """True on TPU generations with a 256x256 MXU and bf16 EUP (v6e / v7x)."""
    try:
        kind = jax.devices()[0].device_kind.lower()
    except Exception:
        return False
    return any(tag in kind for tag in ("v6", "v7", "7x"))


# ---------------------------------------------------------------------------
# Kernel
# ---------------------------------------------------------------------------
def _mlp_kernel(x_ref, y_ref, t_ref,
                w1x_ref, w1y_ref, w1t_ref, b1_ref,
                w2_ref, b2_ref, w3_ref, b3_ref,
                w4_ref, b4_ref, w5_ref, b5_ref,
                w6_ref, b6_ref,
                out_ref, *, compute_dtype, tanh_bf16):
    """One batch tile of the lane-packed, sigmoid-folded 6-layer MLP.

    Weights were pre-folded so each hidden layer is exactly tanh(dot + b);
    the original sigmoid's 0.5 scale/offset lives in the constants.
    """
    cd = compute_dtype
    f32 = jnp.float32

    def act(z_f32):
        # tanh on the EUP; bf16 tanh on v6e/v7x, f32 elsewhere.  Output is
        # already in the matmul operand dtype for the next layer.
        if tanh_bf16:
            return jnp.tanh(z_f32.astype(cd))
        return jnp.tanh(z_f32).astype(cd)

    # Layer 1: three skinny dots (x / y / t each hold PACK samples per row).
    z = (jnp.dot(x_ref[...].astype(cd), w1x_ref[...], preferred_element_type=f32)
         + jnp.dot(y_ref[...].astype(cd), w1y_ref[...], preferred_element_type=f32)
         + jnp.dot(t_ref[...].astype(cd), w1t_ref[...], preferred_element_type=f32)
         + b1_ref[...])
    h = act(z)

    # Hidden layers 2-5: block-diagonal (lane-packed) S x S weights.
    for w_ref, b_ref in ((w2_ref, b2_ref), (w3_ref, b3_ref),
                         (w4_ref, b4_ref), (w5_ref, b5_ref)):
        h = act(jnp.dot(h, w_ref[...], preferred_element_type=f32) + b_ref[...])

    # Output layer (no activation).  Output stays (tm, PACK); lane-dense
    # repack skipped on purpose (tiny output volume, would need XLU shuffle).
    out = jnp.dot(h, w6_ref[...], preferred_element_type=f32) + b6_ref[...]
    out_ref[...] = out.astype(out_ref.dtype)


# ---------------------------------------------------------------------------
# Parameter construction / packing (trace-time wrapper glue)
# ---------------------------------------------------------------------------
def init_params(key, size):
    """PyTorch nn.Linear-style init (U(-k, k), k = 1/sqrt(fan_in)).

    Weights stored as (fan_in, fan_out); biases as (1, fan_out), all f32.
    """
    dims = [(3, size), (size, size), (size, size),
            (size, size), (size, size), (size, 1)]
    params = []
    for fan_in, fan_out in dims:
        key, kw, kb = jax.random.split(key, 3)
        bound = 1.0 / jnp.sqrt(jnp.asarray(fan_in, jnp.float32))
        w = jax.random.uniform(kw, (fan_in, fan_out), jnp.float32, -bound, bound)
        b = jax.random.uniform(kb, (1, fan_out), jnp.float32, -bound, bound)
        params.append((w, b))
    return params


def _fold_sigmoid(params):
    """Constant-fold sigmoid(z) = 0.5*tanh(0.5*z) + 0.5 into the weights.

    After folding, the kernel computes
      t_1 = tanh(inputs @ W1' + b1')
      t_k = tanh(t_{k-1} @ Wk' + bk')       (k = 2..5)
      out = t_5 @ W6' + b6'
    which reproduces the original sigmoid MLP exactly.
    """
    (w1, b1), *mids, (w6, b6) = params
    folded = [(0.5 * w1, 0.5 * b1)]
    for w, b in mids:
        folded.append((0.25 * w,
                       0.5 * b + 0.25 * jnp.sum(w, axis=0, keepdims=True)))
    folded.append((0.5 * w6, b6 + 0.5 * jnp.sum(w6, axis=0, keepdims=True)))
    return folded


def _pack_params(params, pack, compute_dtype):
    """Fold sigmoids and lane-pack the parameters.

    Hidden S x S weights become (PACK*S, PACK*S) block-diagonal matrices; the
    first layer splits into three (PACK, PACK*S) matrices (sample j in lane j
    of the x/y/t blocks); the output layer becomes (PACK*S, PACK).  Weights
    are cast once to the matmul operand dtype; biases stay f32 (added to the
    f32 accumulator in-kernel).
    """
    folded = _fold_sigmoid(params)
    eye = jnp.eye(pack, dtype=jnp.float32)

    w1, b1 = folded[0]                                           # (3, S), (1, S)
    packed = [jnp.kron(eye, w1[i:i + 1, :]).astype(compute_dtype)
              for i in range(3)]                                 # 3 x (PACK, PACK*S)
    packed.append(jnp.tile(b1, (1, pack)))                       # (1, PACK*S) f32
    for w, b in folded[1:]:
        packed.append(jnp.kron(eye, w).astype(compute_dtype))
        packed.append(jnp.tile(b, (1, pack)))
    return packed


# ---------------------------------------------------------------------------
# Forward wrapper
# ---------------------------------------------------------------------------
def net_forward(params, x, y, t, *, block_rows=1024, compute_dtype=jnp.bfloat16):
    """x, y, t: (N, 1) float32 arrays. Returns (N, 1) float32."""
    n = x.shape[0]
    s = params[0][0].shape[1]                          # hidden width

    new_gen = _is_256_mxu_tpu()
    mxu_lanes = 256 if new_gen else 128
    pack = mxu_lanes // s if (s <= mxu_lanes and mxu_lanes % s == 0) else 1
    tanh_bf16 = bool(new_gen) and compute_dtype == jnp.bfloat16

    n_rows = pl.cdiv(n, pack)                          # packed rows needed
    # Cap the tile so the grid keeps >= 2 steps when possible (v7x: 2 TCs).
    tm = min(block_rows, _round_up(pl.cdiv(n_rows, 2), 8))
    rows_pad = _round_up(n_rows, tm)
    n_pad = rows_pad * pack
    grid = (rows_pad // tm,)

    # Each coordinate becomes (rows_pad, PACK): pad only if needed, then a
    # free row-major reshape.  No concat round trip through HBM.
    def pack_input(a):
        a = a.astype(jnp.float32).reshape(n, 1)
        if n_pad != n:
            a = jnp.pad(a, ((0, n_pad - n), (0, 0)))
        return a.reshape(rows_pad, pack)

    xp, yp, tp = pack_input(x), pack_input(y), pack_input(t)

    flat_params = _pack_params(params, pack, compute_dtype)

    data_spec = pl.BlockSpec((tm, pack), lambda i: (i, 0))
    in_specs = [data_spec, data_spec, data_spec]
    for p in flat_params:
        # Full-array block + constant index_map -> fetched once, VMEM-resident.
        in_specs.append(pl.BlockSpec(p.shape, lambda i: (0, 0)))
    out_spec = pl.BlockSpec((tm, pack), lambda i: (i, 0))

    param_bytes = sum(int(p.size) * p.dtype.itemsize for p in flat_params)
    cost = pl.CostEstimate(
        flops=2 * n_pad * (3 * s + 4 * s * s + s),
        transcendentals=5 * n_pad * s,
        bytes_accessed=n_pad * 16 + param_bytes,
    )

    kernel = functools.partial(_mlp_kernel,
                               compute_dtype=compute_dtype,
                               tanh_bf16=tanh_bf16)

    out = pl.pallas_call(
        kernel,
        out_shape=jax.ShapeDtypeStruct((rows_pad, pack), jnp.float32),
        grid=grid,
        in_specs=in_specs,
        out_specs=out_spec,
        compiler_params=pltpu.CompilerParams(
            dimension_semantics=("parallel",),
            vmem_limit_bytes=32 * 1024 * 1024),
        cost_estimate=cost,
    )(xp, yp, tp, *flat_params)

    return out.reshape(n_pad, 1)[:n]


def net_forward_ref(params, x, y, t):
    """Pure-JAX reference (exact PyTorch forward) for correctness checking."""
    h = jnp.concatenate([x, y, t], axis=1).astype(jnp.float32)
    for i, (w, b) in enumerate(params):
        h = h @ w + b
        if i < len(params) - 1:
            h = jax.nn.sigmoid(h)
    return h


if __name__ == "__main__":
    key = jax.random.PRNGKey(0)
    size = 32                     # hidden width of the MLP

    kp, kd = jax.random.split(key)
    params = init_params(kp, size)

    # Small single-tile batch and a multi-tile batch (exercises the grid,
    # padding, and the output slice).
    for batch in (8, 2500):
        kx, ky, kt, kd = jax.random.split(kd, 4)
        x = jax.random.uniform(kx, (batch, 1), jnp.float32)
        y = jax.random.uniform(ky, (batch, 1), jnp.float32)
        t = jax.random.uniform(kt, (batch, 1), jnp.float32)

        ref = net_forward_ref(params, x, y, t)

        # Exact-parity path (f32 matmuls, folded sigmoid) -- tight tolerance.
        out_f32 = jax.block_until_ready(
            net_forward(params, x, y, t, compute_dtype=jnp.float32))
        assert out_f32.shape == (batch, 1)
        assert jnp.allclose(out_f32, ref, atol=2e-5, rtol=1e-5), \
            float(jnp.max(jnp.abs(out_f32 - ref)))

        # Fast path (bf16 matmul operands, f32 accumulation) -- tolerance set
        # by bf16 operand quantization.
        out_bf16 = jax.block_until_ready(net_forward(params, x, y, t))
        assert out_bf16.shape == (batch, 1)
        assert jnp.allclose(out_bf16, ref, atol=3e-2, rtol=3e-2), \
            float(jnp.max(jnp.abs(out_bf16 - ref)))

    print("KERNEL_OK")
</pallas_src>

<mosaic_0001>
module attributes {stable_mosaic.version = 11 : i64} {
  func.func @_mlp_kernel(%arg0: i32, %arg1: memref<8x4xf32, #tpu.memory_space<vmem>>, %arg2: memref<8x4xf32, #tpu.memory_space<vmem>>, %arg3: memref<8x4xf32, #tpu.memory_space<vmem>>, %arg4: memref<4x128xf32, #tpu.memory_space<vmem>>, %arg5: memref<4x128xf32, #tpu.memory_space<vmem>>, %arg6: memref<4x128xf32, #tpu.memory_space<vmem>>, %arg7: memref<1x128xf32, #tpu.memory_space<vmem>>, %arg8: memref<128x128xf32, #tpu.memory_space<vmem>>, %arg9: memref<1x128xf32, #tpu.memory_space<vmem>>, %arg10: memref<128x128xf32, #tpu.memory_space<vmem>>, %arg11: memref<1x128xf32, #tpu.memory_space<vmem>>, %arg12: memref<128x128xf32, #tpu.memory_space<vmem>>, %arg13: memref<1x128xf32, #tpu.memory_space<vmem>>, %arg14: memref<128x128xf32, #tpu.memory_space<vmem>>, %arg15: memref<1x128xf32, #tpu.memory_space<vmem>>, %arg16: memref<128x4xf32, #tpu.memory_space<vmem>>, %arg17: memref<1x4xf32, #tpu.memory_space<vmem>>, %arg18: memref<8x4xf32, #tpu.memory_space<vmem>>) attributes {dimension_semantics = [#tpu.dimension_semantics<parallel>], iteration_bounds = array<i64: 1>, scalar_prefetch = 0 : i64, scratch_operands = 0 : i64, tpu.core_type = #tpu.core_type<tc>, window_params = [{transform_indices = @transform_0, window_bounds = array<i64: 8, 4>}, {transform_indices = @transform_1, window_bounds = array<i64: 8, 4>}, {transform_indices = @transform_2, window_bounds = array<i64: 8, 4>}, {pipeline_mode = #tpu.pipeline_mode<synchronous>, transform_indices = @transform_3, window_bounds = array<i64: 4, 128>}, {pipeline_mode = #tpu.pipeline_mode<synchronous>, transform_indices = @transform_4, window_bounds = array<i64: 4, 128>}, {pipeline_mode = #tpu.pipeline_mode<synchronous>, transform_indices = @transform_5, window_bounds = array<i64: 4, 128>}, {pipeline_mode = #tpu.pipeline_mode<synchronous>, transform_indices = @transform_6, window_bounds = array<i64: 1, 128>}, {pipeline_mode = #tpu.pipeline_mode<synchronous>, transform_indices = @transform_7, window_bounds = array<i64: 128, 128>}, {pipeline_mode = #tpu.pipeline_mode<synchronous>, transform_indices = @transform_8, window_bounds = array<i64: 1, 128>}, {pipeline_mode = #tpu.pipeline_mode<synchronous>, transform_indices = @transform_9, window_bounds = array<i64: 128, 128>}, {pipeline_mode = #tpu.pipeline_mode<synchronous>, transform_indices = @transform_10, window_bounds = array<i64: 1, 128>}, {pipeline_mode = #tpu.pipeline_mode<synchronous>, transform_indices = @transform_11, window_bounds = array<i64: 128, 128>}, {pipeline_mode = #tpu.pipeline_mode<synchronous>, transform_indices = @transform_12, window_bounds = array<i64: 1, 128>}, {pipeline_mode = #tpu.pipeline_mode<synchronous>, transform_indices = @transform_13, window_bounds = array<i64: 128, 128>}, {pipeline_mode = #tpu.pipeline_mode<synchronous>, transform_indices = @transform_14, window_bounds = array<i64: 1, 128>}, {pipeline_mode = #tpu.pipeline_mode<synchronous>, transform_indices = @transform_15, window_bounds = array<i64: 128, 4>}, {pipeline_mode = #tpu.pipeline_mode<synchronous>, transform_indices = @transform_16, window_bounds = array<i64: 1, 4>}, {transform_indices = @transform_17, window_bounds = array<i64: 8, 4>}]} {
    %c0 = arith.constant 0 : index
    %c0_0 = arith.constant 0 : index
    %0 = vector.load %arg1[%c0, %c0_0] : memref<8x4xf32, #tpu.memory_space<vmem>>, vector<8x4xf32>
    %c0_1 = arith.constant 0 : index
    %c0_2 = arith.constant 0 : index
    %1 = vector.load %arg4[%c0_1, %c0_2] : memref<4x128xf32, #tpu.memory_space<vmem>>, vector<4x128xf32>
    %cst = arith.constant dense<0.000000e+00> : vector<8x128xf32>
    %2 = tpu.matmul %0, %1, %cst {dimension_numbers = #tpu.dot_dimension_numbers<[1], [0], [0], [1], [0, 0, 1, 1], [], []>} : vector<8x4xf32>, vector<4x128xf32>, vector<8x128xf32> -> vector<8x128xf32>
    %c0_3 = arith.constant 0 : index
    %c0_4 = arith.constant 0 : index
    %3 = vector.load %arg2[%c0_3, %c0_4] : memref<8x4xf32, #tpu.memory_space<vmem>>, vector<8x4xf32>
    %c0_5 = arith.constant 0 : index
    %c0_6 = arith.constant 0 : index
    %4 = vector.load %arg5[%c0_5, %c0_6] : memref<4x128xf32, #tpu.memory_space<vmem>>, vector<4x128xf32>
    %cst_7 = arith.constant dense<0.000000e+00> : vector<8x128xf32>
    %5 = tpu.matmul %3, %4, %cst_7 {dimension_numbers = #tpu.dot_dimension_numbers<[1], [0], [0], [1], [0, 0, 1, 1], [], []>} : vector<8x4xf32>, vector<4x128xf32>, vector<8x128xf32> -> vector<8x128xf32>
    %6 = arith.addf %2, %5 : vector<8x128xf32>
    %c0_8 = arith.constant 0 : index
    %c0_9 = arith.constant 0 : index
    %7 = vector.load %arg3[%c0_8, %c0_9] : memref<8x4xf32, #tpu.memory_space<vmem>>, vector<8x4xf32>
    %c0_10 = arith.constant 0 : index
    %c0_11 = arith.constant 0 : index
    %8 = vector.load %arg6[%c0_10, %c0_11] : memref<4x128xf32, #tpu.memory_space<vmem>>, vector<4x128xf32>
    %cst_12 = arith.constant dense<0.000000e+00> : vector<8x128xf32>
    %9 = tpu.matmul %7, %8, %cst_12 {dimension_numbers = #tpu.dot_dimension_numbers<[1], [0], [0], [1], [0, 0, 1, 1], [], []>} : vector<8x4xf32>, vector<4x128xf32>, vector<8x128xf32> -> vector<8x128xf32>
    %10 = arith.addf %6, %9 : vector<8x128xf32>
    %c0_13 = arith.constant 0 : index
    %c0_14 = arith.constant 0 : index
    %11 = vector.load %arg7[%c0_13, %c0_14] : memref<1x128xf32, #tpu.memory_space<vmem>>, vector<1x128xf32>
    %12 = vector.broadcast %11 : vector<1x128xf32> to vector<8x128xf32>
    %13 = arith.addf %10, %12 : vector<8x128xf32>
    %14 = math.tanh %13 : vector<8x128xf32>
    %c0_15 = arith.constant 0 : index
    %c0_16 = arith.constant 0 : index
    %15 = vector.load %arg8[%c0_15, %c0_16] : memref<128x128xf32, #tpu.memory_space<vmem>>, vector<128x128xf32>
    %cst_17 = arith.constant dense<0.000000e+00> : vector<8x128xf32>
    %16 = tpu.matmul %14, %15, %cst_17 {dimension_numbers = #tpu.dot_dimension_numbers<[1], [0], [0], [1], [0, 0, 1, 1], [], []>} : vector<8x128xf32>, vector<128x128xf32>, vector<8x128xf32> -> vector<8x128xf32>
    %c0_18 = arith.constant 0 : index
    %c0_19 = arith.constant 0 : index
    %17 = vector.load %arg9[%c0_18, %c0_19] : memref<1x128xf32, #tpu.memory_space<vmem>>, vector<1x128xf32>
    %18 = vector.broadcast %17 : vector<1x128xf32> to vector<8x128xf32>
    %19 = arith.addf %16, %18 : vector<8x128xf32>
    %20 = math.tanh %19 : vector<8x128xf32>
    %c0_20 = arith.constant 0 : index
    %c0_21 = arith.constant 0 : index
    %21 = vector.load %arg10[%c0_20, %c0_21] : memref<128x128xf32, #tpu.memory_space<vmem>>, vector<128x128xf32>
    %cst_22 = arith.constant dense<0.000000e+00> : vector<8x128xf32>
    %22 = tpu.matmul %20, %21, %cst_22 {dimension_numbers = #tpu.dot_dimension_numbers<[1], [0], [0], [1], [0, 0, 1, 1], [], []>} : vector<8x128xf32>, vector<128x128xf32>, vector<8x128xf32> -> vector<8x128xf32>
    %c0_23 = arith.constant 0 : index
    %c0_24 = arith.constant 0 : index
    %23 = vector.load %arg11[%c0_23, %c0_24] : memref<1x128xf32, #tpu.memory_space<vmem>>, vector<1x128xf32>
    %24 = vector.broadcast %23 : vector<1x128xf32> to vector<8x128xf32>
    %25 = arith.addf %22, %24 : vector<8x128xf32>
    %26 = math.tanh %25 : vector<8x128xf32>
    %c0_25 = arith.constant 0 : index
    %c0_26 = arith.constant 0 : index
    %27 = vector.load %arg12[%c0_25, %c0_26] : memref<128x128xf32, #tpu.memory_space<vmem>>, vector<128x128xf32>
    %cst_27 = arith.constant dense<0.000000e+00> : vector<8x128xf32>
    %28 = tpu.matmul %26, %27, %cst_27 {dimension_numbers = #tpu.dot_dimension_numbers<[1], [0], [0], [1], [0, 0, 1, 1], [], []>} : vector<8x128xf32>, vector<128x128xf32>, vector<8x128xf32> -> vector<8x128xf32>
    %c0_28 = arith.constant 0 : index
    %c0_29 = arith.constant 0 : index
    %29 = vector.load %arg13[%c0_28, %c0_29] : memref<1x128xf32, #tpu.memory_space<vmem>>, vector<1x128xf32>
    %30 = vector.broadcast %29 : vector<1x128xf32> to vector<8x128xf32>
    %31 = arith.addf %28, %30 : vector<8x128xf32>
    %32 = math.tanh %31 : vector<8x128xf32>
    %c0_30 = arith.constant 0 : index
    %c0_31 = arith.constant 0 : index
    %33 = vector.load %arg14[%c0_30, %c0_31] : memref<128x128xf32, #tpu.memory_space<vmem>>, vector<128x128xf32>
    %cst_32 = arith.constant dense<0.000000e+00> : vector<8x128xf32>
    %34 = tpu.matmul %32, %33, %cst_32 {dimension_numbers = #tpu.dot_dimension_numbers<[1], [0], [0], [1], [0, 0, 1, 1], [], []>} : vector<8x128xf32>, vector<128x128xf32>, vector<8x128xf32> -> vector<8x128xf32>
    %c0_33 = arith.constant 0 : index
    %c0_34 = arith.constant 0 : index
    %35 = vector.load %arg15[%c0_33, %c0_34] : memref<1x128xf32, #tpu.memory_space<vmem>>, vector<1x128xf32>
    %36 = vector.broadcast %35 : vector<1x128xf32> to vector<8x128xf32>
    %37 = arith.addf %34, %36 : vector<8x128xf32>
    %38 = math.tanh %37 : vector<8x128xf32>
    %c0_35 = arith.constant 0 : index
    %c0_36 = arith.constant 0 : index
    %39 = vector.load %arg16[%c0_35, %c0_36] : memref<128x4xf32, #tpu.memory_space<vmem>>, vector<128x4xf32>
    %cst_37 = arith.constant dense<0.000000e+00> : vector<8x4xf32>
    %40 = tpu.matmul %38, %39, %cst_37 {dimension_numbers = #tpu.dot_dimension_numbers<[1], [0], [0], [1], [0, 0, 1, 1], [], []>} : vector<8x128xf32>, vector<128x4xf32>, vector<8x4xf32> -> vector<8x4xf32>
    %c0_38 = arith.constant 0 : index
    %c0_39 = arith.constant 0 : index
    %41 = vector.load %arg17[%c0_38, %c0_39] : memref<1x4xf32, #tpu.memory_space<vmem>>, vector<1x4xf32>
    %42 = vector.broadcast %41 : vector<1x4xf32> to vector<8x4xf32>
    %43 = arith.addf %40, %42 : vector<8x4xf32>
    %c0_40 = arith.constant 0 : index
    %c0_41 = arith.constant 0 : index
    %44 = vector.load %arg18[%c0_40, %c0_41] : memref<8x4xf32, #tpu.memory_space<vmem>>, vector<8x4xf32>
    tpu.vector_store %arg18[%c0_40, %c0_41], %43 {strides = array<i32>} : memref<8x4xf32, #tpu.memory_space<vmem>>, vector<8x4xf32>,
    return
  }
  func.func @transform_0(%arg0: i32) -> (i32, i32) {
    %c0_i32 = arith.constant 0 : i32
    %c0_i32_0 = arith.constant 0 : i32
    return %arg0, %c0_i32 : i32, i32
  }
  func.func @transform_1(%arg0: i32) -> (i32, i32) {
    %c0_i32 = arith.constant 0 : i32
    %c0_i32_0 = arith.constant 0 : i32
    return %arg0, %c0_i32 : i32, i32
  }
  func.func @transform_2(%arg0: i32) -> (i32, i32) {
    %c0_i32 = arith.constant 0 : i32
    %c0_i32_0 = arith.constant 0 : i32
    return %arg0, %c0_i32 : i32, i32
  }
  func.func @transform_3(%arg0: i32) -> (i32, i32) {
    %c0_i32 = arith.constant 0 : i32
    %c0_i32_0 = arith.constant 0 : i32
    %c0_i32_1 = arith.constant 0 : i32
    return %c0_i32, %c0_i32_0 : i32, i32
  }
  func.func @transform_4(%arg0: i32) -> (i32, i32) {
    %c0_i32 = arith.constant 0 : i32
    %c0_i32_0 = arith.constant 0 : i32
    %c0_i32_1 = arith.constant 0 : i32
    return %c0_i32, %c0_i32_0 : i32, i32
  }
  func.func @transform_5(%arg0: i32) -> (i32, i32) {
    %c0_i32 = arith.constant 0 : i32
    %c0_i32_0 = arith.constant 0 : i32
    %c0_i32_1 = arith.constant 0 : i32
    return %c0_i32, %c0_i32_0 : i32, i32
  }
  func.func @transform_6(%arg0: i32) -> (i32, i32) {
    %c0_i32 = arith.constant 0 : i32
    %c0_i32_0 = arith.constant 0 : i32
    %c0_i32_1 = arith.constant 0 : i32
    return %c0_i32, %c0_i32_0 : i32, i32
  }
  func.func @transform_7(%arg0: i32) -> (i32, i32) {
    %c0_i32 = arith.constant 0 : i32
    %c0_i32_0 = arith.constant 0 : i32
    %c0_i32_1 = arith.constant 0 : i32
    return %c0_i32, %c0_i32_0 : i32, i32
  }
  func.func @transform_8(%arg0: i32) -> (i32, i32) {
    %c0_i32 = arith.constant 0 : i32
    %c0_i32_0 = arith.constant 0 : i32
    %c0_i32_1 = arith.constant 0 : i32
    return %c0_i32, %c0_i32_0 : i32, i32
  }
  func.func @transform_9(%arg0: i32) -> (i32, i32) {
    %c0_i32 = arith.constant 0 : i32
    %c0_i32_0 = arith.constant 0 : i32
    %c0_i32_1 = arith.constant 0 : i32
    return %c0_i32, %c0_i32_0 : i32, i32
  }
  func.func @transform_10(%arg0: i32) -> (i32, i32) {
    %c0_i32 = arith.constant 0 : i32
    %c0_i32_0 = arith.constant 0 : i32
    %c0_i32_1 = arith.constant 0 : i32
    return %c0_i32, %c0_i32_0 : i32, i32
  }
  func.func @transform_11(%arg0: i32) -> (i32, i32) {
    %c0_i32 = arith.constant 0 : i32
    %c0_i32_0 = arith.constant 0 : i32
    %c0_i32_1 = arith.constant 0 : i32
    return %c0_i32, %c0_i32_0 : i32, i32
  }
  func.func @transform_12(%arg0: i32) -> (i32, i32) {
    %c0_i32 = arith.constant 0 : i32
    %c0_i32_0 = arith.constant 0 : i32
    %c0_i32_1 = arith.constant 0 : i32
    return %c0_i32, %c0_i32_0 : i32, i32
  }
  func.func @transform_13(%arg0: i32) -> (i32, i32) {
    %c0_i32 = arith.constant 0 : i32
    %c0_i32_0 = arith.constant 0 : i32
    %c0_i32_1 = arith.constant 0 : i32
    return %c0_i32, %c0_i32_0 : i32, i32
  }
  func.func @transform_14(%arg0: i32) -> (i32, i32) {
    %c0_i32 = arith.constant 0 : i32
    %c0_i32_0 = arith.constant 0 : i32
    %c0_i32_1 = arith.constant 0 : i32
    return %c0_i32, %c0_i32_0 : i32, i32
  }
  func.func @transform_15(%arg0: i32) -> (i32, i32) {
    %c0_i32 = arith.constant 0 : i32
    %c0_i32_0 = arith.constant 0 : i32
    %c0_i32_1 = arith.constant 0 : i32
    return %c0_i32, %c0_i32_0 : i32, i32
  }
  func.func @transform_16(%arg0: i32) -> (i32, i32) {
    %c0_i32 = arith.constant 0 : i32
    %c0_i32_0 = arith.constant 0 : i32
    %c0_i32_1 = arith.constant 0 : i32
    return %c0_i32, %c0_i32_0 : i32, i32
  }
  func.func @transform_17(%arg0: i32) -> (i32, i32) {
    %c0_i32 = arith.constant 0 : i32
    %c0_i32_0 = arith.constant 0 : i32
    return %arg0, %c0_i32 : i32, i32
  }
}

</mosaic_0001>

<bundles_post_ra>
// kernel: tpu_custom_call.1
= control target key start
LH: loop header
LB: loop body
LE: loop exit
PB: predicated region body
PF: predicated region fallthrough
CT: control target
= control target key end

     0   :  { %s753_s0 = inlined_call_operand.vmem [shape: f32[8,4], index: 0, kind: input, shape index: {}]   ;;  %s754_s1 = inlined_call_operand.vmem [shape: f32[8,4], index: 1, kind: input, shape index: {}]   ;;  %s755_s2 = inlined_call_operand.vmem [shape: f32[8,4], index: 2, kind: input, shape index: {}]   ;;  %s756_s3 = inlined_call_operand.vmem [shape: f32[4,128], index: 3, kind: input, shape index: {}]   ;;  %s757_s4 = inlined_call_operand.vmem [shape: f32[4,128], index: 4, kind: input, shape index: {}]   ;;  %s758_s5 = inlined_call_operand.vmem [shape: f32[4,128], index: 5, kind: input, shape index: {}]   ;;  %s759_s6 = inlined_call_operand.vmem [shape: f32[1,128], index: 6, kind: input, shape index: {}]   ;;  %s760_s7 = inlined_call_operand.vmem [shape: f32[128,128], index: 7, kind: input, shape index: {}]   ;;  %s761_s8 = inlined_call_operand.vmem [shape: f32[1,128], index: 8, kind: input, shape index: {}]   ;;  %s762_s9 = inlined_call_operand.hbm [shape: f32[128,128], index: 9, kind: input, shape index: {}]   ;;  %s763_s10 = inlined_call_operand.vmem [shape: f32[1,128], index: 10, kind: input, shape index: {}]   ;;  %s764_s11 = inlined_call_operand.hbm [shape: f32[128,128], index: 11, kind: input, shape index: {}]   ;;  %s765_s12 = inlined_call_operand.vmem [shape: f32[1,128], index: 12, kind: input, shape index: {}]   ;;  %s766_s13 = inlined_call_operand.hbm [shape: f32[128,128], index: 13, kind: input, shape index: {}]   ;;  %s767_s14 = inlined_call_operand.vmem [shape: f32[1,128], index: 14, kind: input, shape index: {}]   ;;  %s768_s15 = inlined_call_operand.vmem [shape: f32[128,4], index: 15, kind: input, shape index: {}]   ;;  %s769_s16 = inlined_call_operand.vmem [shape: f32[1,4], index: 16, kind: input, shape index: {}]   ;;  %s770_s17 = inlined_call_operand.vmem [shape: f32[8,4], index: 17, kind: output, shape index: {}]  }
   0x1   :  { %771 = sst [smem:[#allocation9_spill]] %s753_s0 }
   0x2   :  { %772 = sst [smem:[#allocation10_spill]] %s754_s1 }
   0x3   :  { %22 = vsyncpa [#allocation3], 0 }
   0x4   :  { %23 = vsyncpa [#allocation5], 0  ;;  %s61_s26 = sshll.u32 %s764_s11, 4  ;;  %s510_s27 = smov [#allocation4]   ;;  %s62_s26 = int_to_ptr.hbm [resolvable:$true] %s61_s26 }
   0x5   :  { %s63_s28 = sshll.u32 %s510_s27, 4  ;;  %s46_s30 = sshll.u32 %s762_s9, 4  ;;  %s64_s28 = int_to_ptr.vmem [resolvable:$true] %s63_s28  ;;  %s47_s30 = int_to_ptr.hbm [resolvable:$true] %s46_s30 }
   0x6   :  { %s511_s18 = smov 128   ;;  %s512_s19 = smov 8  }
   0x7   :  { %69 = dma.hbm_to_vmem [thread:$0]  %s62_s26, 2048, %s64_s28, [#allocation5], %s511_s18, %s511_s18, %s512_s19  }
   0x8   :  { %s513_s1 = smov [#allocation2]   ;;  %s76_s23 = sshll.u32 %s766_s13, 4  ;;  %s77_s23 = int_to_ptr.hbm [resolvable:$true] %s76_s23 }
   0x9   :  { %s48_s20 = sshll.u32 %s513_s1, 4  ;;  %s514_s11 = smov [#allocation6]   ;;  %s49_s20 = int_to_ptr.vmem [resolvable:$true] %s48_s20 }
   0xa   :  { %54 = dma.hbm_to_vmem [thread:$0]  %s47_s30, 2048, %s49_s20, [#allocation3], %s511_s18, %s511_s18, %s512_s19  }
   0xb   :  { %s78_s24 = sshll.u32 %s514_s11, 4  ;;  %s79_s24 = int_to_ptr.vmem [resolvable:$true] %s78_s24 }
   0xc   :  { %84 = dma.hbm_to_vmem [thread:$0]  %s77_s23, 2048, %s79_s24, [#allocation5], %s511_s18, %s511_s18, %s512_s19  }
   0xd   :  { %506 = dma.done.wait [#allocation3], 2048  }
   0xe   :  { %507 = vsyncadd [#allocation3], 4294965248 }
   0xf   :  { %508 = dma.done.wait [#allocation5], 4096  }
  0x10   :  { %509 = vsyncadd [#allocation5], 4294963200  ;;  %vm111_vm0 = vcmask 1043456   ;;  %vm107_vm1 = vcmask 31744   ;;  %v162_v0 = vld [vmem:[%s758_s5] sm:$0xf] }
  0x11   :  { %v161_v1 = vld [vmem:[%s755_s2] sm:$0xff]  ;;  %411 = vmatpush.msk.msra.mxu2 %vm111_vm0, %v162_v0  ;;  %s773_s19 = sld [smem:[#allocation10_spill]]  ;;  %v211_v6 = vld [vmem:[%s760_s7 + $0x78] sm:$0xff]  ;;  %v210_v7 = vld [vmem:[%s760_s7 + $0x70] sm:$0xff] }
  0x12   :  { %v106_v2 = vld [vmem:[%s757_s4] sm:$0xf]  ;;  %s774_s20 = sld [smem:[#allocation9_spill]]  ;;  %412 = vmatmul.msk.f32.vlgmr.msra.gmra.mxu2 %vm107_vm1, %v161_v1  ;;  %216 = vmatpush.msra.mxu3 %v211_v6  ;;  %v209_v8 = vld [vmem:[%s760_s7 + $0x68] sm:$0xff]  ;;  %v207_v10 = vld [vmem:[%s760_s7 + $0x58] sm:$0xff] }
  0x13   :  { %407 = vmatpush.msk.msra.mxu0 %vm111_vm0, %v106_v2  ;;  %v104_v3 = vld [vmem:[%s756_s3] sm:$0xf]  ;;  %v206_v11 = vld [vmem:[%s760_s7 + $0x50] sm:$0xff]  ;;  %v205_v12 = vld [vmem:[%s760_s7 + $0x48] sm:$0xff] }
  0x14   :  { %409 = vmatpush.msk.msra.mxu1 %vm111_vm0, %v104_v3  ;;  %217 = vmatpush.msra.mxu3 %v210_v7  ;;  %v208_v9 = vld [vmem:[%s760_s7 + $0x60] sm:$0xff]  ;;  %v203_v14 = vld [vmem:[%s760_s7 + $0x38] sm:$0xff]  ;;  %v202_v15 = vld [vmem:[%s760_s7 + $0x30] sm:$0xff] }
  0x15   :  { %v204_v13 = vld [vmem:[%s760_s7 + $0x40] sm:$0xff]  ;;  %v201_v16 = vld [vmem:[%s760_s7 + $0x28] sm:$0xff]  ;;  %v199_v18 = vld [vmem:[%s760_s7 + $0x18] sm:$0xff] }
  0x16   :  { %218 = vmatpush.msra.mxu3 %v209_v8  ;;  %v200_v17 = vld [vmem:[%s760_s7 + $0x20] sm:$0xff]  ;;  %v198_v19 = vld [vmem:[%s760_s7 + $0x10] sm:$0xff]  ;;  %v197_v20 = vld [vmem:[%s760_s7 + $0x8] sm:$0xff] }
  0x17   :  { %v105_v4 = vld [vmem:[%s773_s19] sm:$0xff]  ;;  %v252_v22 = vld [vmem:[#allocation2 + $0x78] sm:$0xff]  ;;  %v251_v23 = vld [vmem:[#allocation2 + $0x70] sm:$0xff] }
  0x18   :  { %v103_v5 = vld [vmem:[%s774_s20] sm:$0xff]  ;;  %408 = vmatmul.msk.f32.vlgmr.msra.gmra.mxu0 %vm107_vm1, %v105_v4  ;;  %219 = vmatpush.msra.mxu3 %v208_v9  ;;  %v250_v24 = vld [vmem:[#allocation2 + $0x68] sm:$0xff]  ;;  %v248_v26 = vld [vmem:[#allocation2 + $0x58] sm:$0xff] }
  0x19   :  { %410 = vmatmul.msk.f32.vlgmr.msra.gmra.mxu1 %vm107_vm1, %v103_v5  ;;  %v196_v21 = vld [vmem:[%s760_s7] sm:$0xff]  ;;  %257 = vmatpush.msrb.mxu0 %v252_v22  ;;  %v247_v27 = vld [vmem:[#allocation2 + $0x50] sm:$0xff]  ;;  %v246_v28 = vld [vmem:[#allocation2 + $0x48] sm:$0xff] }
  0x1a   :  { %220 = vmatpush.msra.mxu3 %v207_v10  ;;  %v249_v25 = vld [vmem:[#allocation2 + $0x60] sm:$0xff]  ;;  %v244_v30 = vld [vmem:[#allocation2 + $0x38] sm:$0xff]  ;;  %v243_v33 = vld [vmem:[#allocation2 + $0x30] sm:$0xff] }
  0x1b   :  { %258 = vmatpush.msrb.mxu0 %v251_v23  ;;  %v245_v29 = vld [vmem:[#allocation2 + $0x40] sm:$0xff]  ;;  %v242_v35 = vld [vmem:[#allocation2 + $0x28] sm:$0xff]  ;;  %v240_v42 = vld [vmem:[#allocation2 + $0x18] sm:$0xff] }
  0x1c   :  { %221 = vmatpush.msra.mxu3 %v206_v11  ;;  %v418_v36 = vld [vmem:[%s759_s6] ss:$0 sm:$0xff]  ;;  %v239_v43 = vld [vmem:[#allocation2 + $0x10] sm:$0xff]  ;;  %v238_v44 = vld [vmem:[#allocation2 + $0x8] sm:$0xff] }
  0x1d   :  { %259 = vmatpush.msrb.mxu0 %v250_v24  ;;  %v241_v41 = vld [vmem:[#allocation2 + $0x20] sm:$0xff]  ;;  %v293_v46 = vld [vmem:[#allocation4 + $0x78] sm:$0xff]  ;;  %v292_v47 = vld [vmem:[#allocation4 + $0x70] sm:$0xff] }
  0x1e   :  { %222 = vmatpush.msra.mxu3 %v205_v12  ;;  %v237_v45 = vld [vmem:[#allocation2] sm:$0xff]  ;;  %298 = vmatpush.msrb.mxu1 %v293_v46  ;;  %v291_v48 = vld [vmem:[#allocation4 + $0x68] sm:$0xff]  ;;  %v289_v50 = vld [vmem:[#allocation4 + $0x58] sm:$0xff] }
  0x1f   :  { %260 = vmatpush.msrb.mxu0 %v249_v25  ;;  %v290_v49 = vld [vmem:[#allocation4 + $0x60] sm:$0xff]  ;;  %v288_v51 = vld [vmem:[#allocation4 + $0x50] sm:$0xff]  ;;  %v287_v52 = vld [vmem:[#allocation4 + $0x48] sm:$0xff] }
  0x20   :  { %223 = vmatpush.msra.mxu3 %v204_v13  ;;  %299 = vmatpush.msrb.mxu1 %v292_v47  ;;  %v286_v53 = vld [vmem:[#allocation4 + $0x40] sm:$0xff]  ;;  %v285_v54 = vld [vmem:[#allocation4 + $0x38] sm:$0xff]  ;;  %v284_v55 = vld [vmem:[#allocation4 + $0x30] sm:$0xff] }
  0x21   :  { %261 = vmatpush.msrb.mxu0 %v248_v26  ;;  %v283_v56 = vld [vmem:[#allocation4 + $0x28] sm:$0xff]  ;;  %v419_v57 = vld [vmem:[%s761_s8] ss:$0 sm:$0xff]  ;;  %v281_v62 = vld [vmem:[#allocation4 + $0x18] sm:$0xff] }
  0x22   :  { %224 = vmatpush.msra.mxu3 %v203_v14  ;;  %300 = vmatpush.msrb.mxu1 %v291_v48  ;;  %v282_v61 = vld [vmem:[#allocation4 + $0x20] sm:$0xff]  ;;  %v280_v63 = vld [vmem:[#allocation4 + $0x10] sm:$0xff]  ;;  %v279_v0 = vld [vmem:[#allocation4 + $0x8] sm:$0xff] }
  0x23   :  { %262 = vmatpush.msrb.mxu0 %v247_v27  ;;  %v278_v1 = vld [vmem:[#allocation4] sm:$0xff]  ;;  %v334_v2 = vld [vmem:[#allocation6 + $0x78] sm:$0xff]  ;;  %v333_v3 = vld [vmem:[#allocation6 + $0x70] sm:$0xff] }
  0x24   :  { %225 = vmatpush.msra.mxu3 %v202_v15  ;;  %301 = vmatpush.msrb.mxu1 %v290_v49  ;;  %v332_v4 = vld [vmem:[#allocation6 + $0x68] sm:$0xff]  ;;  %v331_v5 = vld [vmem:[#allocation6 + $0x60] sm:$0xff]  ;;  %v330_v6 = vld [vmem:[#allocation6 + $0x58] sm:$0xff] }
  0x25   :  { %263 = vmatpush.msrb.mxu0 %v246_v28  ;;  %339 = vmatpush.msrb.mxu2 %v334_v2  ;;  %v329_v7 = vld [vmem:[#allocation6 + $0x50] sm:$0xff]  ;;  %v328_v8 = vld [vmem:[#allocation6 + $0x48] sm:$0xff]  ;;  %v327_v9 = vld [vmem:[#allocation6 + $0x40] sm:$0xff] }
  0x26   :  { %226 = vmatpush.msra.mxu3 %v201_v16  ;;  %302 = vmatpush.msrb.mxu1 %v289_v50  ;;  %v326_v10 = vld [vmem:[#allocation6 + $0x38] sm:$0xff]  ;;  %v325_v11 = vld [vmem:[#allocation6 + $0x30] sm:$0xff]  ;;  %v324_v12 = vld [vmem:[#allocation6 + $0x28] sm:$0xff] }
  0x27   :  { %264 = vmatpush.msrb.mxu0 %v245_v29  ;;  %340 = vmatpush.msrb.mxu2 %v333_v3  ;;  %v420_v13 = vld [vmem:[%s763_s10] ss:$0 sm:$0xff]  ;;  %v375_v22 = vld [vmem:[%s768_s15 + $0x78] sm:$0xff]  ;;  %v374_v23 = vld [vmem:[%s768_s15 + $0x70] sm:$0xff] }
  0x28   :  { %227 = vmatpush.msra.mxu3 %v200_v17  ;;  %303 = vmatpush.msrb.mxu1 %v288_v51  ;;  %v323_v17 = vld [vmem:[#allocation6 + $0x20] sm:$0xff]  ;;  %v373_v24 = vld [vmem:[%s768_s15 + $0x68] sm:$0xff]  ;;  %v371_v26 = vld [vmem:[%s768_s15 + $0x58] sm:$0xff] }
  0x29   :  { %265 = vmatpush.msrb.mxu0 %v244_v30  ;;  %341 = vmatpush.msrb.mxu2 %v332_v4  ;;  %v372_v25 = vld [vmem:[%s768_s15 + $0x60] sm:$0xff]  ;;  %v370_v27 = vld [vmem:[%s768_s15 + $0x50] sm:$0xff]  ;;  %v369_v28 = vld [vmem:[%s768_s15 + $0x48] sm:$0xff] }
  0x2a   :  { %228 = vmatpush.msra.mxu3 %v199_v18  ;;  %304 = vmatpush.msrb.mxu1 %v287_v52  ;;  %v322_v18 = vld [vmem:[#allocation6 + $0x18] sm:$0xff]  ;;  %v368_v29 = vld [vmem:[%s768_s15 + $0x40] sm:$0xff] }
  0x2b   :  { %266 = vmatpush.msrb.mxu0 %v243_v33  ;;  %342 = vmatpush.msrb.mxu2 %v331_v5  ;;  %v367_v30 = vld [vmem:[%s768_s15 + $0x38] sm:$0xff]  ;;  %v421_v33 = vld [vmem:[%s765_s12] ss:$0 sm:$0xff] }
  0x2c   :  { %229 = vmatpush.msra.mxu3 %v198_v19  ;;  %305 = vmatpush.msrb.mxu1 %v286_v53  ;;  %v321_v19 = vld [vmem:[#allocation6 + $0x10] sm:$0xff]  ;;  %v423_v46 = vld [vmem:[%s769_s16] ss:$0 sm:$0xff] }
  0x2d   :  { %267 = vmatpush.msrb.mxu0 %v242_v35  ;;  %343 = vmatpush.msrb.mxu2 %v330_v6 }
  0x2e   :  { %230 = vmatpush.msra.mxu3 %v197_v20  ;;  %306 = vmatpush.msrb.mxu1 %v285_v54  ;;  %v320_v20 = vld [vmem:[#allocation6 + $0x8] sm:$0xff] }
  0x2f   :  { %268 = vmatpush.msrb.mxu0 %v241_v41  ;;  %344 = vmatpush.msrb.mxu2 %v329_v7  ;;  %v360_v41 = vld [vmem:[%s768_s15] sm:$0xff] }
  0x30   :  { %231 = vmatpush.msra.mxu3 %v196_v21  ;;  %307 = vmatpush.msrb.mxu1 %v284_v55  ;;  %v319_v21 = vld [vmem:[#allocation6] sm:$0xff] }
  0x31   :  { %269 = vmatpush.msrb.mxu0 %v240_v42  ;;  %345 = vmatpush.msrb.mxu2 %v328_v8  ;;  %v422_v42 = vld [vmem:[%s767_s14] ss:$0 sm:$0xff] }
  0x32   :  { %308 = vmatpush.msrb.mxu1 %v283_v56  ;;  %380 = vmatpush.msrb.mxu3 %v375_v22 }
  0x33   :  { %270 = vmatpush.msrb.mxu0 %v239_v43  ;;  %346 = vmatpush.msrb.mxu2 %v327_v9 }
  0x34   :  { %309 = vmatpush.msrb.mxu1 %v282_v61  ;;  %381 = vmatpush.msrb.mxu3 %v374_v23 }
  0x35   :  { %271 = vmatpush.msrb.mxu0 %v238_v44  ;;  %347 = vmatpush.msrb.mxu2 %v326_v10 }
  0x36   :  { %310 = vmatpush.msrb.mxu1 %v281_v62  ;;  %382 = vmatpush.msrb.mxu3 %v373_v24 }
  0x37   :  { %272 = vmatpush.msrb.mxu0 %v237_v45  ;;  %348 = vmatpush.msrb.mxu2 %v325_v11 }
  0x38   :  { %311 = vmatpush.msrb.mxu1 %v280_v63  ;;  %383 = vmatpush.msrb.mxu3 %v372_v25 }
  0x39   :  { %349 = vmatpush.msrb.mxu2 %v324_v12 }
  0x3a   :  { %312 = vmatpush.msrb.mxu1 %v279_v0  ;;  %384 = vmatpush.msrb.mxu3 %v371_v26 }
  0x3b   :  { %350 = vmatpush.msrb.mxu2 %v323_v17 }
  0x3c   :  { %313 = vmatpush.msrb.mxu1 %v278_v1  ;;  %385 = vmatpush.msrb.mxu3 %v370_v27 }
  0x3d   :  { %351 = vmatpush.msrb.mxu2 %v322_v18 }
  0x3e   :  { %386 = vmatpush.msrb.mxu3 %v369_v28 }
  0x3f   :  { %352 = vmatpush.msrb.mxu2 %v321_v19 }
  0x40   :  { %387 = vmatpush.msrb.mxu3 %v368_v29 }
  0x41   :  { %353 = vmatpush.msrb.mxu2 %v320_v20 }
  0x42   :  { %388 = vmatpush.msrb.mxu3 %v367_v30 }
  0x43   :  { %354 = vmatpush.msrb.mxu2 %v319_v21 }
  0x95   :  { %v132_v31 = vpop.f32.mrf.mxu0  ;;  %v186_v37 = vpop.f32.mrf.mxu2 }
  0x96   :  { %v158_v32 = vpop.f32.mrf.mxu1 }
  0x97   :  { %v159_v34 = vadd.f32 %v158_v32, %v132_v31  ;;  %v366_v31 = vld [vmem:[%s768_s15 + $0x30] sm:$0xff]  ;;  %v365_v32 = vld [vmem:[%s768_s15 + $0x28] sm:$0xff] }
  0x98   :  { %389 = vmatpush.msrb.mxu3 %v366_v31 }
  0x99   :  { %v189_v38 = vadd.f32 %v186_v37, %v159_v34  ;;  %v364_v37 = vld [vmem:[%s768_s15 + $0x20] sm:$0xff] }
  0x9a   :  { %390 = vmatpush.msrb.mxu3 %v365_v32 }
  0x9b   :  { %v194_v39 = vadd.f32 %v418_v36, %v189_v38  ;;  %v363_v38 = vld [vmem:[%s768_s15 + $0x18] sm:$0xff] }
  0x9c   :  { %391 = vmatpush.msrb.mxu3 %v364_v37 }
  0x9d   :  { %424 = vtanh.f32 %v194_v39  ;;  %v362_v39 = vld [vmem:[%s768_s15 + $0x10] sm:$0xff] }
  0x9e   :  { %392 = vmatpush.msrb.mxu3 %v363_v38 }
  0xa0   :  { %393 = vmatpush.msrb.mxu3 %v362_v39 }
  0xa3   :  { %v425_v40 = vpop.eup %424 }
  0xa4   :  { %232 = vmatmul.f32.vlgmr.msra.gmra.mxu3 %v425_v40  ;;  %v361_v40 = vld [vmem:[%s768_s15 + $0x8] sm:$0xff] }
  0xa5   :  { %394 = vmatpush.msrb.mxu3 %v361_v40 }
  0xa7   :  { %395 = vmatpush.msrb.mxu3 %v360_v41 }
 0x127   :  { %v233_v58 = vpop.f32.mrf.mxu3 }
 0x128   :  { %v234_v59 = vadd.f32 %v419_v57, %v233_v58 }
 0x12a   :  { %426 = vtanh.f32 %v234_v59 }
 0x130   :  { %v427_v60 = vpop.eup %426 }
 0x131   :  { %273 = vmatmul.f32.vlgmr.msrb.gmra.mxu0 %v427_v60 }
 0x1ae   :  { %v274_v14 = vpop.f32.mrf.mxu0 }
 0x1af   :  { %v275_v15 = vadd.f32 %v420_v13, %v274_v14 }
 0x1b1   :  { %428 = vtanh.f32 %v275_v15 }
 0x1b7   :  { %v429_v16 = vpop.eup %428 }
 0x1b8   :  { %314 = vmatmul.f32.vlgmr.msrb.gmra.mxu1 %v429_v16 }
 0x235   :  { %v315_v34 = vpop.f32.mrf.mxu1 }
 0x236   :  { %v316_v35 = vadd.f32 %v421_v33, %v315_v34 }
 0x238   :  { %430 = vtanh.f32 %v316_v35 }
 0x23e   :  { %v431_v36 = vpop.eup %430 }
 0x23f   :  { %355 = vmatmul.f32.vlgmr.msrb.gmra.mxu2 %v431_v36 }
 0x2c2   :  { %v356_v43 = vpop.f32.mrf.mxu2 }
 0x2c3   :  { %v357_v44 = vadd.f32 %v422_v42, %v356_v43 }
 0x2c5   :  { %432 = vtanh.f32 %v357_v44 }
 0x2cb   :  { %v433_v45 = vpop.eup %432 }
 0x2cc   :  { %396 = vmatmul.f32.vlgmr.msrb.gmra.mxu3 %v433_v45 }
 0x34f   :  { %v397_v47 = vpop.f32.mrf.mxu3 }
 0x350   :  { %v398_v48 = vadd.f32 %v423_v46, %v397_v47 }
 0x352   :  { %400 = vst.msk [vmem:[%s770_s17] sm:$0xff] %vm107_vm1, %v398_v48 }
 0x353   :  { %405 = vsyncpa [#allocation3], 1 }
 0x354   :  { %406 = vsyncpa [#allocation5], 1 }

</bundles_post_ra>
